<compile_context>
chip_gen: v7x
topology: tpu7x:2x2x1
jax: 0.10.0
libtpu: 0.0.40
codegen_flags: <defaults>
</compile_context>

<pallas_src>
import jax
import jax.numpy as jnp
from jax.experimental import pallas as pl
from jax.experimental.pallas import tpu as pltpu


def _round_up(x, m):
    return (x + m - 1) // m * m


def _mlp4_kernel(x_ref, w_ref, b_ref, o_ref):
    """Fused 4-layer MLP: (Linear -> LeakyReLU(0.2)) x 4, all in VMEM.

    x_ref: (TILE_B, Z)   w_ref: (4, Z, Z)   b_ref: (4, Z)   o_ref: (TILE_B, Z)
    """
    neg_slope = jnp.float32(0.2)
    h = x_ref[...]
    for l in range(4):  # static unroll: 4 back-to-back MXU matmuls, f32 accumulation
        h = jnp.dot(h.astype(w_ref.dtype), w_ref[l],
                    preferred_element_type=jnp.float32)
        h = h + b_ref[l:l + 1, :].astype(jnp.float32)
        h = jnp.maximum(h, neg_slope * h)          # LeakyReLU(0.2): single vmax
    o_ref[...] = h.astype(o_ref.dtype)


def initial_linear_forward(z, w_stack, b_stack, *, max_tile_b=256):
    """z: (B, Z). w_stack: (4, Z, Z) stored transposed (in, out). b_stack: (4, Z)."""
    B, Z = z.shape
    assert w_stack.shape == (4, Z, Z)
    assert b_stack.shape == (4, Z)

    # Batch tile: multiple of 8 (sublane), capped (Z=32 rows are lane-padded; >512
    # rows of live f32 h would spill vregs). Pad B up to a multiple of the tile.
    tile_b = min(max_tile_b, _round_up(B, 8))
    b_pad = _round_up(B, tile_b)
    z_in = jnp.pad(z, ((0, b_pad - B), (0, 0))) if b_pad != B else z
    grid = (b_pad // tile_b,)

    itemsize = jnp.dtype(z.dtype).itemsize
    vmem_bytes = (w_stack.size * jnp.dtype(w_stack.dtype).itemsize
                  + b_stack.size * jnp.dtype(b_stack.dtype).itemsize
                  + 2 * 2 * tile_b * Z * itemsize      # double-buffered x + out tiles
                  + (2 << 20))                         # slack
    vmem_bytes = int(min(max(vmem_bytes, 4 << 20), 64 << 20))  # v7x physical cap

    out = pl.pallas_call(
        _mlp4_kernel,
        out_shape=jax.ShapeDtypeStruct((b_pad, Z), z.dtype),
        grid=grid,
        in_specs=[
            pl.BlockSpec((tile_b, Z), lambda i: (i, 0)),    # x: pipelined over batch
            pl.BlockSpec((4, Z, Z), lambda i: (0, 0, 0)),   # weights: VMEM-resident
            pl.BlockSpec((4, Z), lambda i: (0, 0)),         # biases:  VMEM-resident
        ],
        out_specs=pl.BlockSpec((tile_b, Z), lambda i: (i, 0)),
        compiler_params=pltpu.CompilerParams(
            dimension_semantics=("parallel",),              # v7x: 2 TCs split batch
            vmem_limit_bytes=vmem_bytes,
        ),
    )(z_in, w_stack, b_stack)

    return out[:B] if b_pad != B else out


def init_params(key, z_size, weight_dtype=jnp.float32):
    """Deterministic init mirroring nn.Linear's default U(-1/sqrt(in), 1/sqrt(in))."""
    bound = 1.0 / (z_size ** 0.5)
    ws, bs = [], []
    for i in range(4):
        kw, kb = jax.random.split(jax.random.fold_in(key, i))
        # PyTorch weight is (out, in); store transposed (in, out) for h @ W.
        ws.append(jax.random.uniform(kw, (z_size, z_size), jnp.float32, -bound, bound))
        bs.append(jax.random.uniform(kb, (z_size,), jnp.float32, -bound, bound))
    return jnp.stack(ws).astype(weight_dtype), jnp.stack(bs)


def reference_forward(z, w_stack, b_stack):
    h = z
    for l in range(4):
        h = h @ w_stack[l].astype(h.dtype) + b_stack[l]
        h = jnp.maximum(h, 0.2 * h)
    return h


if __name__ == "__main__":
    key = jax.random.PRNGKey(0)
    z_size = 32
    k_in, k_p = jax.random.split(key)
    w_stack, b_stack = init_params(k_p, z_size)

    # Small shape consistent with the module.
    z_small = jax.random.normal(k_in, (8, z_size), jnp.float32)
    out_small = jax.block_until_ready(initial_linear_forward(z_small, w_stack, b_stack))
    ref_small = reference_forward(z_small, w_stack, b_stack)
    assert out_small.shape == z_small.shape
    assert jnp.allclose(out_small, ref_small, atol=1e-4, rtol=1e-4), "mismatch (small batch)"

    # Exercise the gridded + padded path (multi-tile batch, not a multiple of the tile).
    z_big = jax.random.normal(jax.random.fold_in(k_in, 1), (300, z_size), jnp.float32)
    out_big = jax.block_until_ready(initial_linear_forward(z_big, w_stack, b_stack))
    ref_big = reference_forward(z_big, w_stack, b_stack)
    assert out_big.shape == z_big.shape
    assert jnp.allclose(out_big, ref_big, atol=1e-4, rtol=1e-4), "mismatch (gridded batch)"

    print("KERNEL_OK")
</pallas_src>

<mosaic_0001>
module attributes {stable_mosaic.version = 11 : i64} {
  func.func @_mlp4_kernel(%arg0: i32, %arg1: memref<8x32xf32, #tpu.memory_space<vmem>>, %arg2: memref<4x32x32xf32, #tpu.memory_space<vmem>>, %arg3: memref<4x32xf32, #tpu.memory_space<vmem>>, %arg4: memref<8x32xf32, #tpu.memory_space<vmem>>) attributes {dimension_semantics = [#tpu.dimension_semantics<parallel>], iteration_bounds = array<i64: 1>, scalar_prefetch = 0 : i64, scratch_operands = 0 : i64, tpu.core_type = #tpu.core_type<tc>, window_params = [{transform_indices = @transform_0, window_bounds = array<i64: 8, 32>}, {pipeline_mode = #tpu.pipeline_mode<synchronous>, transform_indices = @transform_1, window_bounds = array<i64: 4, 32, 32>}, {pipeline_mode = #tpu.pipeline_mode<synchronous>, transform_indices = @transform_2, window_bounds = array<i64: 4, 32>}, {transform_indices = @transform_3, window_bounds = array<i64: 8, 32>}]} {
    %c0 = arith.constant 0 : index
    %c0_0 = arith.constant 0 : index
    %0 = vector.load %arg1[%c0, %c0_0] : memref<8x32xf32, #tpu.memory_space<vmem>>, vector<8x32xf32>
    %c0_1 = arith.constant 0 : index
    %c0_2 = arith.constant 0 : index
    %c0_3 = arith.constant 0 : index
    %1 = vector.load %arg2[%c0_1, %c0_2, %c0_3] : memref<4x32x32xf32, #tpu.memory_space<vmem>>, vector<1x32x32xf32>
    %2 = vector.shape_cast %1 : vector<1x32x32xf32> to vector<32x32xf32>
    %cst = arith.constant dense<0.000000e+00> : vector<8x32xf32>
    %3 = tpu.matmul %0, %2, %cst {dimension_numbers = #tpu.dot_dimension_numbers<[1], [0], [0], [1], [0, 0, 1, 1], [], []>} : vector<8x32xf32>, vector<32x32xf32>, vector<8x32xf32> -> vector<8x32xf32>
    %c0_4 = arith.constant 0 : index
    %c0_5 = arith.constant 0 : index
    %4 = vector.load %arg3[%c0_4, %c0_5] : memref<4x32xf32, #tpu.memory_space<vmem>>, vector<1x32xf32>
    %5 = vector.broadcast %4 : vector<1x32xf32> to vector<8x32xf32>
    %6 = arith.addf %3, %5 : vector<8x32xf32>
    %cst_6 = arith.constant 2.000000e-01 : f32
    %7 = vector.broadcast %cst_6 : f32 to vector<8x32xf32>
    %8 = arith.mulf %7, %6 : vector<8x32xf32>
    %9 = arith.maximumf %6, %8 : vector<8x32xf32>
    %c1 = arith.constant 1 : index
    %c0_7 = arith.constant 0 : index
    %c0_8 = arith.constant 0 : index
    %10 = vector.load %arg2[%c1, %c0_7, %c0_8] : memref<4x32x32xf32, #tpu.memory_space<vmem>>, vector<1x32x32xf32>
    %11 = vector.shape_cast %10 : vector<1x32x32xf32> to vector<32x32xf32>
    %cst_9 = arith.constant dense<0.000000e+00> : vector<8x32xf32>
    %12 = tpu.matmul %9, %11, %cst_9 {dimension_numbers = #tpu.dot_dimension_numbers<[1], [0], [0], [1], [0, 0, 1, 1], [], []>} : vector<8x32xf32>, vector<32x32xf32>, vector<8x32xf32> -> vector<8x32xf32>
    %c1_10 = arith.constant 1 : index
    %c0_11 = arith.constant 0 : index
    %13 = vector.load %arg3[%c1_10, %c0_11] : memref<4x32xf32, #tpu.memory_space<vmem>>, vector<1x32xf32>
    %14 = vector.broadcast %13 : vector<1x32xf32> to vector<8x32xf32>
    %15 = arith.addf %12, %14 : vector<8x32xf32>
    %cst_12 = arith.constant 2.000000e-01 : f32
    %16 = vector.broadcast %cst_12 : f32 to vector<8x32xf32>
    %17 = arith.mulf %16, %15 : vector<8x32xf32>
    %18 = arith.maximumf %15, %17 : vector<8x32xf32>
    %c2 = arith.constant 2 : index
    %c0_13 = arith.constant 0 : index
    %c0_14 = arith.constant 0 : index
    %19 = vector.load %arg2[%c2, %c0_13, %c0_14] : memref<4x32x32xf32, #tpu.memory_space<vmem>>, vector<1x32x32xf32>
    %20 = vector.shape_cast %19 : vector<1x32x32xf32> to vector<32x32xf32>
    %cst_15 = arith.constant dense<0.000000e+00> : vector<8x32xf32>
    %21 = tpu.matmul %18, %20, %cst_15 {dimension_numbers = #tpu.dot_dimension_numbers<[1], [0], [0], [1], [0, 0, 1, 1], [], []>} : vector<8x32xf32>, vector<32x32xf32>, vector<8x32xf32> -> vector<8x32xf32>
    %c2_16 = arith.constant 2 : index
    %c0_17 = arith.constant 0 : index
    %22 = vector.load %arg3[%c2_16, %c0_17] : memref<4x32xf32, #tpu.memory_space<vmem>>, vector<1x32xf32>
    %23 = vector.broadcast %22 : vector<1x32xf32> to vector<8x32xf32>
    %24 = arith.addf %21, %23 : vector<8x32xf32>
    %cst_18 = arith.constant 2.000000e-01 : f32
    %25 = vector.broadcast %cst_18 : f32 to vector<8x32xf32>
    %26 = arith.mulf %25, %24 : vector<8x32xf32>
    %27 = arith.maximumf %24, %26 : vector<8x32xf32>
    %c3 = arith.constant 3 : index
    %c0_19 = arith.constant 0 : index
    %c0_20 = arith.constant 0 : index
    %28 = vector.load %arg2[%c3, %c0_19, %c0_20] : memref<4x32x32xf32, #tpu.memory_space<vmem>>, vector<1x32x32xf32>
    %29 = vector.shape_cast %28 : vector<1x32x32xf32> to vector<32x32xf32>
    %cst_21 = arith.constant dense<0.000000e+00> : vector<8x32xf32>
    %30 = tpu.matmul %27, %29, %cst_21 {dimension_numbers = #tpu.dot_dimension_numbers<[1], [0], [0], [1], [0, 0, 1, 1], [], []>} : vector<8x32xf32>, vector<32x32xf32>, vector<8x32xf32> -> vector<8x32xf32>
    %c3_22 = arith.constant 3 : index
    %c0_23 = arith.constant 0 : index
    %31 = vector.load %arg3[%c3_22, %c0_23] : memref<4x32xf32, #tpu.memory_space<vmem>>, vector<1x32xf32>
    %32 = vector.broadcast %31 : vector<1x32xf32> to vector<8x32xf32>
    %33 = arith.addf %30, %32 : vector<8x32xf32>
    %cst_24 = arith.constant 2.000000e-01 : f32
    %34 = vector.broadcast %cst_24 : f32 to vector<8x32xf32>
    %35 = arith.mulf %34, %33 : vector<8x32xf32>
    %36 = arith.maximumf %33, %35 : vector<8x32xf32>
    %c0_25 = arith.constant 0 : index
    %c0_26 = arith.constant 0 : index
    %37 = vector.load %arg4[%c0_25, %c0_26] : memref<8x32xf32, #tpu.memory_space<vmem>>, vector<8x32xf32>
    tpu.vector_store %arg4[%c0_25, %c0_26], %36 {strides = array<i32>} : memref<8x32xf32, #tpu.memory_space<vmem>>, vector<8x32xf32>,
    return
  }
  func.func @transform_0(%arg0: i32) -> (i32, i32) {
    %c0_i32 = arith.constant 0 : i32
    %c0_i32_0 = arith.constant 0 : i32
    return %arg0, %c0_i32 : i32, i32
  }
  func.func @transform_1(%arg0: i32) -> (i32, i32, i32) {
    %c0_i32 = arith.constant 0 : i32
    %c0_i32_0 = arith.constant 0 : i32
    %c0_i32_1 = arith.constant 0 : i32
    %c0_i32_2 = arith.constant 0 : i32
    return %c0_i32, %c0_i32_0, %c0_i32_1 : i32, i32, i32
  }
  func.func @transform_2(%arg0: i32) -> (i32, i32) {
    %c0_i32 = arith.constant 0 : i32
    %c0_i32_0 = arith.constant 0 : i32
    %c0_i32_1 = arith.constant 0 : i32
    return %c0_i32, %c0_i32_0 : i32, i32
  }
  func.func @transform_3(%arg0: i32) -> (i32, i32) {
    %c0_i32 = arith.constant 0 : i32
    %c0_i32_0 = arith.constant 0 : i32
    return %arg0, %c0_i32 : i32, i32
  }
}

</mosaic_0001>

<bundles_post_ra>
// kernel: tpu_custom_call.1
= control target key start
LH: loop header
LB: loop body
LE: loop exit
PB: predicated region body
PF: predicated region fallthrough
CT: control target
= control target key end

     0   :  { %8 = vsyncpa [#allocation3], 0  ;;  %s667_s0 = inlined_call_operand.hbm [shape: f32[8,32], index: 0, kind: input, shape index: {}]   ;;  %s668_s1 = inlined_call_operand.hbm [shape: f32[4,32,32], index: 1, kind: input, shape index: {}]   ;;  %s669_s2 = inlined_call_operand.vmem [shape: f32[4,32], index: 2, kind: input, shape index: {}]   ;;  %s670_s3 = inlined_call_operand.hbm [shape: f32[8,32], index: 3, kind: output, shape index: {}]  }
   0x1   :  { %9 = vsyncpa [#allocation6], 0 }
   0x2   :  { %10 = vsyncpa [#allocation4], 0  ;;  %s575_s12 = smov [#allocation2]   ;;  %s576_s14 = smov [#allocation5]  }
   0x3   :  { %s17_s13 = sshll.u32 %s575_s12, 4  ;;  %s26_s15 = sshll.u32 %s576_s14, 4  ;;  %s18_s13 = int_to_ptr.vmem [resolvable:$true] %s17_s13  ;;  %s603_s15 = int_to_ptr.vmem [resolvable:$true] %s26_s15 }
   0x4   :  { %s503_s18 = scalar_lea.hbm %s667_s0, 128 }
   0x5   :  { %p504_p0 = scmp.ne.s32.totalorder %s667_s0, %s503_s18  ;;  %p507_p1 = scmp.lt.u32.totalorder %s503_s18, %s667_s0 }
   0x7   :  { %p509_p2 = pnand %p507_p1, %p504_p0 }
   0x9   :  { %512 = shalt.err (!%p509_p2)
}
   0xa   :  { %s513_s23 = scalar_lea.vmem %s18_s13, 128  ;;  %p518_p4 = scmp.lt.s32.totalorder %s18_s13, %s18_s13 }
   0xb   :  { %p514_p3 = scmp.ne.s32.totalorder %s18_s13, %s513_s23  ;;  %p519_p5 = scmp.lt.s32.totalorder %s513_s23, %s513_s23 }
   0xd   :  { %p520_p6 = por %p519_p5, %p518_p4 }
   0xf   :  { %p521_p7 = pnand %p520_p6, %p514_p3 }
  0x11   :  { %524 = shalt.err (!%p521_p7)
}
  0x12   :  { %20 = dma.hbm_to_vmem [thread:$0]  %s667_s0, 128, %s18_s13, [#allocation3]  }
  0x13   :  { %s525_s28 = scalar_lea.hbm %s668_s1, 2048 }
  0x14   :  { %p526_p8 = scmp.ne.s32.totalorder %s668_s1, %s525_s28  ;;  %p529_p9 = scmp.lt.u32.totalorder %s525_s28, %s668_s1 }
  0x16   :  { %p531_p10 = pnand %p529_p9, %p526_p8 }
  0x18   :  { %534 = shalt.err (!%p531_p10)
}
  0x19   :  { %s535_s6 = scalar_lea.vmem %s603_s15, 2048  ;;  %p540_p12 = scmp.lt.s32.totalorder %s603_s15, %s603_s15 }
  0x1a   :  { %p536_p11 = scmp.ne.s32.totalorder %s603_s15, %s535_s6  ;;  %p541_p13 = scmp.lt.s32.totalorder %s535_s6, %s535_s6 }
  0x1c   :  { %p542_p0 = por %p541_p13, %p540_p12 }
  0x1e   :  { %p543_p1 = pnand %p542_p0, %p536_p11 }
  0x20   :  { %546 = shalt.err (!%p543_p1)
}
  0x21   :  { %s577_s0 = smov 128   ;;  %s578_s7 = smov 8  }
  0x22   :  { %32 = dma.hbm_to_vmem [thread:$0]  %s668_s1, 2048, %s603_s15, [#allocation6], %s577_s0, %s577_s0, %s578_s7  }
  0x23   :  { %569 = dma.done.wait [#allocation3], 128  }
  0x24   :  { %570 = vsyncadd [#allocation3], 4294967168 }
  0x25   :  { %571 = dma.done.wait [#allocation6], 2048  }
  0x26   :  { %572 = vsyncadd [#allocation6], 4294965248  ;;  %v579_v0 = vmov 0.0|0.0   ;;  %vm580_vm0 = vmmov 0   ;;  %v581_v1 = vmov 0.0   ;;  %v42_v2 = vld [vmem:[#allocation5] sm:$0xff] }
  0x27   :  { %471 = vmatprep.subr.bf16.mxu0 %v579_v0  ;;  %435 = vmatprep.mubr.msk.f32.mxu0 %vm580_vm0, %v581_v1  ;;  %v43_v3 = vld [vmem:[#allocation5 + $0x8] sm:$0xff]  ;;  %v44_v4 = vld [vmem:[#allocation5 + $0x10] sm:$0xff]  ;;  %v45_v6 = vld [vmem:[#allocation5 + $0x18] sm:$0xff]  ;;  %vm51_vm1 = vcmask 261120   ;;  %s582_s17 = smov [#allocation7]  }
  0x28   :  { %477 = vmatprep.subr.bf16.mxu1 %v579_v0  ;;  %446 = vmatprep.mubr.msk.f32.mxu1 %vm580_vm0, %v581_v1  ;;  %v472_v5 = vpack.c.bf16 %v43_v3, %v42_v2  ;;  %v475_v7 = vpack.c.bf16 %v45_v6, %v44_v4  ;;  %v41_v8 = vld [vmem:[#allocation2] sm:$0xff]  ;;  %v128_v9 = vld [vmem:[#allocation5 + $0x20] sm:$0xff]  ;;  %v129_v10 = vld [vmem:[#allocation5 + $0x28] sm:$0xff]  ;;  %s389_s18 = sshll.u32 %s582_s17, 4  ;;  %s390_s18 = int_to_ptr.vmem [resolvable:$true] %s389_s18 }
  0x29   :  { %v478_v11 = vpack.c.bf16 %v129_v10, %v128_v9  ;;  %v130_v12 = vld [vmem:[#allocation5 + $0x30] sm:$0xff]  ;;  %v131_v13 = vld [vmem:[#allocation5 + $0x38] sm:$0xff]  ;;  %v213_v21 = vld [vmem:[#allocation5 + $0x40] sm:$0xff]  ;;  %s547_s19 = scalar_lea.vmem %s390_s18, 128  ;;  %p552_p3 = scmp.lt.s32.totalorder %s390_s18, %s390_s18 }
  0x2a   :  { %473 = vmatpush3.bf16.msra.mxu0 %v472_v5  ;;  %v481_v14 = vpack.c.bf16 %v131_v13, %v130_v12  ;;  %v399_v15 = vld [vmem:[%s669_s2] ss:$0 sm:$0xff]  ;;  %v214_v22 = vld [vmem:[#allocation5 + $0x48] sm:$0xff]  ;;  %v215_v24 = vld [vmem:[#allocation5 + $0x50] sm:$0xff]  ;;  %p548_p2 = scmp.ne.s32.totalorder %s390_s18, %s547_s19  ;;  %p553_p4 = scmp.lt.s32.totalorder %s547_s19, %s547_s19 }
  0x2b   :  { %474 = vmatprep.subr.bf16.mxu0 %v579_v0  ;;  %479 = vmatpush3.bf16.msra.mxu1 %v478_v11  ;;  %v484_v23 = vpack.c.bf16 %v214_v22, %v213_v21  ;;  %v216_v25 = vld [vmem:[#allocation5 + $0x58] sm:$0xff]  ;;  %v298_v33 = vld [vmem:[#allocation5 + $0x60] sm:$0xff]  ;;  %v299_v34 = vld [vmem:[#allocation5 + $0x68] sm:$0xff] }
  0x2c   :  { %480 = vmatprep.subr.bf16.mxu1 %v579_v0  ;;  %v487_v26 = vpack.c.bf16 %v216_v25, %v215_v24  ;;  %v401_v27 = vld [vmem:[%s669_s2 + $0x1] ss:$0 sm:$0xff]  ;;  %v490_v35 = vpack.c.bf16 %v299_v34, %v298_v33  ;;  %v300_v36 = vld [vmem:[#allocation5 + $0x70] sm:$0xff]  ;;  %v403_v39 = vld [vmem:[%s669_s2 + $0x2] ss:$0 sm:$0xff]  ;;  %p554_p5 = por %p553_p4, %p552_p3 }
  0x2d   :  { %v301_v37 = vld [vmem:[#allocation5 + $0x78] sm:$0xff] }
  0x2e   :  { %476 = vmatpush3.bf16.msra.mxu0 %v475_v7  ;;  %v493_v38 = vpack.c.bf16 %v301_v37, %v300_v36  ;;  %v405_v45 = vld [vmem:[%s669_s2 + $0x3] ss:$0 sm:$0xff]  ;;  %p555_p6 = pnand %p554_p5, %p548_p2 }
  0x2f   :  { %483 = vmatprep.subr.bf16.mxu0 %v579_v0  ;;  %482 = vmatpush3.bf16.msra.mxu1 %v481_v14 }
  0x30   :  { %489 = vmatprep.subr.bf16.mxu1 %v579_v0 }
  0x31   :  { %436 = vmatmul.mubr.msk.f32.vlgmr.msra.gmra.mrb[0].mxu0 %vm51_vm1, %v41_v8 }
  0x32   :  { %457 = vmatprep.mubr.msk.f32.mxu0 %vm580_vm0, %v581_v1  ;;  %485 = vmatpush3.bf16.msra.mxu0 %v484_v23 }
  0x33   :  { %486 = vmatprep.subr.bf16.mxu0 %v579_v0 }
  0x36   :  { %488 = vmatpush3.bf16.msra.mxu0 %v487_v26 }
 0x104   :  { %v121_v16 = vpop.f32.mrb[0].mxu0 }
 0x105   :  { %v122_v17 = vadd.f32 %v399_v15, %v121_v16  ;;  %v437_v18 = vpop.f32.mrb[1].mxu0 }
 0x107   :  { %v125_v19 = vmul.f32 0.2, %v122_v17 }
 0x109   :  { %v126_v20 = vmax.f32 %v122_v17, %v125_v19 }
 0x10b   :  { %447 = vmatmul.mubr.msk.f32.vlgmr.msra.gmra.mrb[0].mxu1 %vm51_vm1, %v126_v20 }
 0x10c   :  { %468 = vmatprep.mubr.msk.f32.mxu1 %vm580_vm0, %v581_v1  ;;  %491 = vmatpush3.bf16.msra.mxu1 %v490_v35 }
 0x10d   :  { %492 = vmatprep.subr.bf16.mxu1 %v579_v0 }
 0x110   :  { %494 = vmatpush3.bf16.msra.mxu1 %v493_v38 }
 0x1de   :  { %v206_v28 = vpop.f32.mrb[0].mxu1 }
 0x1df   :  { %v207_v29 = vadd.f32 %v401_v27, %v206_v28  ;;  %v448_v30 = vpop.f32.mrb[1].mxu1 }
 0x1e1   :  { %v210_v31 = vmul.f32 0.2, %v207_v29 }
 0x1e3   :  { %v211_v32 = vmax.f32 %v207_v29, %v210_v31 }
 0x1e5   :  { %458 = vmatmul.mubr.msk.f32.vlgmr.msra.gmra.mrb[2].mxu0 %vm51_vm1, %v211_v32 }
 0x2b8   :  { %v291_v40 = vpop.f32.mrb[2].mxu0 }
 0x2b9   :  { %v292_v41 = vadd.f32 %v403_v39, %v291_v40  ;;  %v459_v42 = vpop.f32.mrb[3].mxu0 }
 0x2bb   :  { %v295_v43 = vmul.f32 0.2, %v292_v41 }
 0x2bd   :  { %v296_v44 = vmax.f32 %v292_v41, %v295_v43 }
 0x2bf   :  { %469 = vmatmul.mubr.msk.f32.vlgmr.msra.gmra.mrb[2].mxu1 %vm51_vm1, %v296_v44 }
 0x392   :  { %v376_v46 = vpop.f32.mrb[2].mxu1 }
 0x393   :  { %v377_v47 = vadd.f32 %v405_v45, %v376_v46  ;;  %v470_v48 = vpop.f32.mrb[3].mxu1 }
 0x395   :  { %v380_v49 = vmul.f32 0.2, %v377_v47 }
 0x397   :  { %v381_v50 = vmax.f32 %v377_v47, %v380_v49 }
 0x399   :  { %382 = vst.msk [vmem:[#allocation7] sm:$0xff] %vm51_vm1, %v381_v50 }
 0x39a   :  { %558 = shalt.err (!%p555_p6)
}
 0x39b   :  { %s559_s2 = scalar_lea.hbm %s670_s3, 128 }
 0x39c   :  { %p560_p7 = scmp.ne.s32.totalorder %s670_s3, %s559_s2  ;;  %p563_p8 = scmp.lt.u32.totalorder %s559_s2, %s670_s3 }
 0x39e   :  { %p565_p9 = pnand %p563_p8, %p560_p7 }
 0x3a0   :  { %568 = shalt.err (!%p565_p9)
}
 0x3a1   :  { %392 = dma.vmem_to_hbm [thread:$0]  %s390_s18, 128, %s670_s3, [#allocation4]  }
 0x3a2   :  { %573 = dma.done.wait [#allocation4], 128  }
 0x3a3   :  { %574 = vsyncadd [#allocation4], 4294967168 }
 0x3a4   :  { %396 = vsyncpa [#allocation3], 1 }
 0x3a5   :  { %397 = vsyncpa [#allocation6], 1 }
 0x3a6   :  { %398 = vsyncpa [#allocation4], 1 }

</bundles_post_ra>
